<compile_context>
chip_gen: v6e
topology: v6e:2x2x1
jax: 0.10.0
libtpu: 0.0.40
codegen_flags: <defaults>
</compile_context>

<pallas_src>
import jax
import jax.numpy as jnp
from jax.experimental import pallas as pl
from jax.experimental.pallas import tpu as pltpu

_SUBLANE = 8  # f32 vreg sublane depth (second-minor tiling)


def _round_up(n, m):
    return ((n + m - 1) // m) * m


def _linear_n1_kernel(x_ref, w_ref, b_ref, o_ref):
    """output_dim == 1 fast path.

    x_ref: (tb, K) f32, w_ref: (1, K) f32 (PyTorch row layout),
    b_ref: (1, 1) f32, o_ref: (tb, 1) f32.
    VPU multiply + XLU lane reduce; no MXU round-trip, no (tb, 128) accumulator.
    """
    prod = x_ref[...] * w_ref[...]                       # (tb, K) on the VPU
    o_ref[...] = jnp.sum(prod, axis=-1, keepdims=True) + b_ref[...]


def _linear_mxu_kernel(x_ref, w_ref, b_ref, o_ref):
    """General path (output_dim > 1): (tb, K) @ (K, N) on the MXU, f32 acc."""
    y = jnp.dot(x_ref[...], w_ref[...], preferred_element_type=jnp.float32)
    o_ref[...] = (y + b_ref[...]).astype(o_ref.dtype)


def linear_regression_forward(x, weight, bias, *, block_batch=4096):
    """x: [batch, input_dim] f32.  weight: [output_dim, input_dim] (PyTorch
    layout).  bias: [output_dim].  Returns [batch, output_dim] float32."""
    batch, input_dim = x.shape
    output_dim = weight.shape[0]
    assert weight.shape == (output_dim, input_dim)
    assert bias.shape == (output_dim,)

    x = x.astype(jnp.float32)
    bias2d = bias.reshape(1, output_dim).astype(jnp.float32)

    # Batch tile: large enough to amortize per-grid-step overhead, rounded to
    # the 8-row sublane depth, capped so large batches yield >= 2 "parallel"
    # grid steps (second TensorCore on v7x).
    tb = min(block_batch, _round_up(max(pl.cdiv(batch, 2), 1), _SUBLANE))
    tb = min(tb, _round_up(batch, _SUBLANE))
    tb = max(tb, _SUBLANE)
    grid = (pl.cdiv(batch, tb),)  # ragged last block handled by Pallas

    if output_dim == 1:
        kernel = _linear_n1_kernel
        w_arg = weight.astype(jnp.float32)                       # (1, K)
        w_spec = pl.BlockSpec((1, input_dim), lambda i: (0, 0))
    else:
        kernel = _linear_mxu_kernel
        w_arg = weight.T.astype(jnp.float32)                     # (K, N)
        w_spec = pl.BlockSpec((input_dim, output_dim), lambda i: (0, 0))

    return pl.pallas_call(
        kernel,
        out_shape=jax.ShapeDtypeStruct((batch, output_dim), jnp.float32),
        grid_spec=pltpu.PrefetchScalarGridSpec(
            num_scalar_prefetch=0,
            grid=grid,
            in_specs=[
                pl.BlockSpec((tb, input_dim), lambda i: (i, 0)),   # x: batch-tiled
                w_spec,                                            # W: VMEM-resident
                pl.BlockSpec((1, output_dim), lambda i: (0, 0)),   # b: VMEM-resident
            ],
            out_specs=pl.BlockSpec((tb, output_dim), lambda i: (i, 0)),
        ),
        compiler_params=pltpu.CompilerParams(
            dimension_semantics=("parallel",)),
    )(x, w_arg, bias2d)


def init_params(key, input_dim, output_dim):
    """PyTorch nn.Linear default init: U(-1/sqrt(fan_in), 1/sqrt(fan_in))."""
    kw, kb = jax.random.split(key)
    bound = 1.0 / jnp.sqrt(jnp.float32(input_dim))
    weight = jax.random.uniform(kw, (output_dim, input_dim), jnp.float32,
                                -bound, bound)
    bias = jax.random.uniform(kb, (output_dim,), jnp.float32, -bound, bound)
    return weight, bias


def reference_forward(x, weight, bias):
    """Pure-f32 reference (broadcast multiply + sum, so XLA's default bf16
    matmul passes can't pollute the comparison)."""
    xf = x.astype(jnp.float32)
    wf = weight.astype(jnp.float32)
    return jnp.sum(xf[:, None, :] * wf[None, :, :], axis=-1) + bias.astype(jnp.float32)


if __name__ == "__main__":
    input_dim, output_dim = 16, 1      # tabular features -> scalar regression

    key = jax.random.PRNGKey(0)
    k_p, k_x, k_x2 = jax.random.split(key, 3)
    weight, bias = init_params(k_p, input_dim, output_dim)

    # Small shape consistent with the module.
    x = jax.random.normal(k_x, (8, input_dim), jnp.float32)
    out = jax.block_until_ready(linear_regression_forward(x, weight, bias))
    ref = reference_forward(x, weight, bias)
    assert out.shape == (8, output_dim), out.shape
    assert jnp.allclose(out, ref, atol=1e-5, rtol=1e-5)

    # Exercise a multi-step "parallel" grid with a ragged last block
    # (no wrapper padding/copies involved).
    x2 = jax.random.normal(k_x2, (600, input_dim), jnp.float32)
    out2 = jax.block_until_ready(
        linear_regression_forward(x2, weight, bias, block_batch=256))
    ref2 = reference_forward(x2, weight, bias)
    assert out2.shape == (600, output_dim), out2.shape
    assert jnp.allclose(out2, ref2, atol=1e-5, rtol=1e-5)

    print("KERNEL_OK")
</pallas_src>

<mosaic_0001>
module attributes {stable_mosaic.version = 11 : i64} {
  func.func @_linear_n1_kernel(%arg0: i32, %arg1: memref<8x16xf32, #tpu.memory_space<vmem>>, %arg2: memref<1x16xf32, #tpu.memory_space<vmem>>, %arg3: memref<1x1xf32, #tpu.memory_space<vmem>>, %arg4: memref<8x1xf32, #tpu.memory_space<vmem>>) attributes {dimension_semantics = [#tpu.dimension_semantics<parallel>], iteration_bounds = array<i64: 1>, scalar_prefetch = 0 : i64, scratch_operands = 0 : i64, tpu.core_type = #tpu.core_type<tc>, window_params = [{transform_indices = @transform_0, window_bounds = array<i64: 8, 16>}, {pipeline_mode = #tpu.pipeline_mode<synchronous>, transform_indices = @transform_1, window_bounds = array<i64: 1, 16>}, {pipeline_mode = #tpu.pipeline_mode<synchronous>, transform_indices = @transform_2, window_bounds = array<i64: 1, 1>}, {transform_indices = @transform_3, window_bounds = array<i64: 8, 1>}]} {
    %c0 = arith.constant 0 : index
    %c0_0 = arith.constant 0 : index
    %0 = vector.load %arg1[%c0, %c0_0] : memref<8x16xf32, #tpu.memory_space<vmem>>, vector<8x16xf32>
    %c0_1 = arith.constant 0 : index
    %c0_2 = arith.constant 0 : index
    %1 = vector.load %arg2[%c0_1, %c0_2] : memref<1x16xf32, #tpu.memory_space<vmem>>, vector<1x16xf32>
    %2 = vector.broadcast %1 : vector<1x16xf32> to vector<8x16xf32>
    %3 = arith.mulf %0, %2 : vector<8x16xf32>
    %cst = arith.constant dense<0.000000e+00> : vector<8xf32>
    %4 = vector.multi_reduction <add>, %3, %cst [1] : vector<8x16xf32> to vector<8xf32>
    %5 = vector.shape_cast %4 : vector<8xf32> to vector<8x1xf32>
    %c0_3 = arith.constant 0 : index
    %c0_4 = arith.constant 0 : index
    %6 = vector.load %arg3[%c0_3, %c0_4] : memref<1x1xf32, #tpu.memory_space<vmem>>, vector<1x1xf32>
    %7 = vector.broadcast %6 : vector<1x1xf32> to vector<8x1xf32>
    %8 = arith.addf %5, %7 : vector<8x1xf32>
    %c0_5 = arith.constant 0 : index
    %c0_6 = arith.constant 0 : index
    %9 = vector.load %arg4[%c0_5, %c0_6] : memref<8x1xf32, #tpu.memory_space<vmem>>, vector<8x1xf32>
    tpu.vector_store %arg4[%c0_5, %c0_6], %8 {strides = array<i32>} : memref<8x1xf32, #tpu.memory_space<vmem>>, vector<8x1xf32>,
    return
  }
  func.func @transform_0(%arg0: i32) -> (i32, i32) {
    %c0_i32 = arith.constant 0 : i32
    %c0_i32_0 = arith.constant 0 : i32
    return %arg0, %c0_i32 : i32, i32
  }
  func.func @transform_1(%arg0: i32) -> (i32, i32) {
    %c0_i32 = arith.constant 0 : i32
    %c0_i32_0 = arith.constant 0 : i32
    %c0_i32_1 = arith.constant 0 : i32
    return %c0_i32, %c0_i32_0 : i32, i32
  }
  func.func @transform_2(%arg0: i32) -> (i32, i32) {
    %c0_i32 = arith.constant 0 : i32
    %c0_i32_0 = arith.constant 0 : i32
    %c0_i32_1 = arith.constant 0 : i32
    return %c0_i32, %c0_i32_0 : i32, i32
  }
  func.func @transform_3(%arg0: i32) -> (i32, i32) {
    %c0_i32 = arith.constant 0 : i32
    %c0_i32_0 = arith.constant 0 : i32
    return %arg0, %c0_i32 : i32, i32
  }
}

</mosaic_0001>

<bundles_post_ra>
// kernel: tpu_custom_call.1
= control target key start
LH: loop header
LB: loop body
LE: loop exit
PB: predicated region body
PF: predicated region fallthrough
CT: control target
= control target key end

     0   :  { %s114_s0 = inlined_call_operand.hbm [shape: f32[8,16], index: 0, kind: input, shape index: {}]   ;;  %s115_s1 = inlined_call_operand.vmem [shape: f32[1,16], index: 1, kind: input, shape index: {}]   ;;  %s116_s2 = inlined_call_operand.<no memory space> [shape: f32[1,1], index: 2, kind: input, shape index: {}]   ;;  %s117_s3 = inlined_call_operand.vmem [shape: f32[8,1], index: 3, kind: output, shape index: {}]  }
   0x1   :  { %v8_v0 = vstv %s116_s2 }
   0x2   :  { %9 = vst [vmem:[#allocation2] sm:$0x1] %v8_v0 }
   0x3   :  { %10 = vsyncpa [#allocation4], 0  ;;  %s81_s14 = smov [#allocation3]  }
   0x4   :  { %s17_s15 = sshll.u32 %s81_s14, 4  ;;  %s18_s15 = int_to_ptr.vmem [resolvable:$true] %s17_s15 }
   0x5   :  { %s67_s16 = scalar_lea.vmem %s18_s15, 128  ;;  %p72_p1 = scmp.lt.s32.totalorder %s18_s15, %s18_s15 }
   0x6   :  { %p68_p0 = scmp.ne.s32.totalorder %s18_s15, %s67_s16  ;;  %p73_p2 = scmp.lt.s32.totalorder %s67_s16, %s67_s16 }
   0x8   :  { %p74_p3 = por %p73_p2, %p72_p1 }
   0xa   :  { %p75_p4 = pnand %p74_p3, %p68_p0 }
   0xc   :  { %78 = shalt.err (!%p75_p4)
}
   0xd   :  { %20 = dma.hbm_to_vmem [thread:$0]  %s114_s0, 128, %s18_s15, [#allocation4]  }
   0xe   :  { %79 = dma.done.wait [#allocation4], 128  }
   0xf   :  { %80 = vsyncadd [#allocation4], 4294967168  ;;  %v28_v1 = vld [vmem:[#allocation3] sm:$0xff]  ;;  %v56_v2 = vld [vmem:[%s115_s1] ss:$0 sm:$0xff]  ;;  %vm37_vm0 = vcmask 130048  }
  0x10   :  { %v36_v3 = vmul.f32 %v56_v2, %v28_v1  ;;  %v57_v5 = vld [vmem:[#allocation2] ss:$0 sm:$0xff]  ;;  %vm49_vm1 = vcmask 7168  }
  0x12   :  { %v38_v4 = vsel %vm37_vm0, %v36_v3, 0.0 }
  0x13   :  { %39 = vadd.xlane.f32.xlu0 %v38_v4 }
  0x9c   :  { %v40_v6 = vpop.xlane.xlu0 %39 }
  0x9d   :  { %v48_v7 = vadd.f32 %v57_v5, %v40_v6 }
  0x9f   :  { %50 = vst.msk [vmem:[%s117_s3] sm:$0xff] %vm49_vm1, %v48_v7 }
  0xa0   :  { %55 = vsyncpa [#allocation4], 1 }

</bundles_post_ra>
